<compile_context>
chip_gen: v6e
topology: v6e:2x2x1
jax: 0.10.0
libtpu: 0.0.40
codegen_flags: <defaults>
</compile_context>

<pallas_src>
import jax
import jax.numpy as jnp
from jax.experimental import pallas as pl
from jax.experimental.pallas import tpu as pltpu

_LANE = 128
# ~6 MiB per operand tile; in+out double-buffered ~= 24 MiB of VMEM.
_TARGET_TILE_BYTES = 6 * 1024 * 1024
# Explicit scoped-VMEM limit: > default on v5e (16 MiB) / v6e,v7x (32 MiB),
# comfortably below v7x's 64 MiB physical per-TC VMEM.
_VMEM_LIMIT_BYTES = 48 << 20
# Lane-block cap for the ragged (n % 128 != 0) path.
_RAGGED_BLOCK_LANES = 64 * 1024


def _unbalanced_weight_kernel(scale_ref, x_ref, o_ref):
    # Scalar lives in SMEM as f32; multiply in f32 and cast the product back
    # so bf16/fp8 inputs are not double-rounded through a narrowed scale.
    s = scale_ref[0]
    o_ref[...] = (x_ref[...].astype(jnp.float32) * s).astype(o_ref.dtype)


def unbalanced_weight(x, eps, rho, *, donate=False):
    """Apply y = (rho + eps/2) * x elementwise via a Pallas TPU kernel.

    If `donate=True`, the output aliases the input buffer
    (input_output_aliases), removing the second full-size HBM allocation when
    the caller can donate x.
    """
    orig_shape = x.shape
    dtype = x.dtype
    n = x.size
    itemsize = jnp.dtype(dtype).itemsize

    # Runtime (1,) f32 operand -> no recompile per (eps, rho).
    scale = jnp.asarray([rho + eps / 2.0], dtype=jnp.float32)

    x_flat = jnp.ravel(x)  # contiguous -> free reshape

    # Packed sublane multiple: 8 (f32), 16 (bf16/f16), 32 (int8/fp8).
    sub = max(8, 32 // itemsize)

    if n % _LANE == 0:
        # ---- zero-copy lane-dense 2-D view (rows, L) ------------------------
        L = next(c for c in (4096, 2048, 1024, 512, 256, 128) if n % c == 0)
        rows = n // L
        x2d = x_flat.reshape(rows, L)
        view_shape = (rows, L)

        max_block_rows = max(
            sub, (_TARGET_TILE_BYTES // (L * itemsize)) // sub * sub
        )
        if rows <= sub:
            # Tiny tensor: single block equal to the full extent (always legal).
            block_rows = rows
        elif rows <= max_block_rows:
            # Whole thing fits in one tile, but split into >= 2 blocks so both
            # v7x TensorCores get work (harmless on single-TC v5e/v6e).
            block_rows = (((rows + 1) // 2) + sub - 1) // sub * sub
        else:
            block_rows = max_block_rows

        block = (block_rows, L)
        grid = (pl.cdiv(rows, block_rows),)
        index_map = lambda i: (i, 0)
    else:
        # ---- ragged size: (1, n) view, lane-blocked, masked tail in-kernel --
        # No jnp.pad / output slice -> no extra full-tensor HBM passes.
        if n < _LANE:
            lb = n                                 # full extent, one tiny block
        elif n <= _RAGGED_BLOCK_LANES:
            lb = (n // _LANE) * _LANE              # one full block + masked tail
        else:
            lb = _RAGGED_BLOCK_LANES
        x2d = x_flat.reshape(1, n)
        view_shape = (1, n)
        block = (1, lb)
        grid = (pl.cdiv(n, lb),)
        index_map = lambda i: (0, i)

    extra_kwargs = {}
    if donate:
        # Alias x (input index 1; index 0 is the SMEM scale) to output 0.
        extra_kwargs["input_output_aliases"] = {1: 0}

    out2d = pl.pallas_call(
        _unbalanced_weight_kernel,
        out_shape=jax.ShapeDtypeStruct(view_shape, dtype),
        grid_spec=pltpu.PrefetchScalarGridSpec(
            num_scalar_prefetch=0,
            grid=grid,
            in_specs=[
                # scale: whole (1,) array resident in SMEM for every step
                pl.BlockSpec(memory_space=pltpu.MemorySpace.SMEM),
                pl.BlockSpec(block, index_map),
            ],
            out_specs=pl.BlockSpec(block, index_map),
        ),
        compiler_params=pltpu.CompilerParams(
            dimension_semantics=("parallel",),
            vmem_limit_bytes=_VMEM_LIMIT_BYTES,
        ),
        cost_estimate=pl.CostEstimate(
            flops=n,
            transcendentals=0,
            bytes_accessed=2 * n * itemsize,
        ),
        **extra_kwargs,
    )(scale, x2d)

    return out2d.reshape(orig_shape)

    # TODO(synk): the module's custom backward (rho + eps) * g is not part of
    # the forward pass and is not implemented here.


if __name__ == "__main__":
    # UnbalancedWeight holds no learnable tensors, only the scalars eps, rho.
    eps = 0.05
    rho = 1.0
    s = rho + eps / 2.0

    key = jax.random.PRNGKey(0)
    k0, k1, k2 = jax.random.split(key, 3)

    # 1) Primary NCHW-ish input: lane-dense divisible path, single block.
    x = jax.random.normal(k0, (2, 4, 16, 16), dtype=jnp.float32)
    y = jax.block_until_ready(unbalanced_weight(x, eps, rho))
    assert y.shape == x.shape and y.dtype == x.dtype
    assert jnp.allclose(y, s * x, rtol=1e-6, atol=1e-6)

    # 2) Multi-block divisible path (grid >= 2, exercises the megacore split).
    x2 = jax.random.normal(k1, (64, 1024), dtype=jnp.float32)
    y2 = jax.block_until_ready(unbalanced_weight(x2, eps, rho))
    assert jnp.allclose(y2, s * x2, rtol=1e-6, atol=1e-6)

    # 3) Ragged size (n % 128 != 0): masked partial tail block, no pad/slice.
    x3 = jax.random.normal(k2, (1000,), dtype=jnp.float32)
    y3 = jax.block_until_ready(unbalanced_weight(x3, eps, rho))
    assert jnp.allclose(y3, s * x3, rtol=1e-6, atol=1e-6)

    print("KERNEL_OK")
</pallas_src>

<mosaic_0001>
module attributes {stable_mosaic.version = 11 : i64} {
  func.func @_unbalanced_weight_kernel(%arg0: i32, %arg1: memref<1xf32, #tpu.memory_space<smem>>, %arg2: memref<1x2048xf32, #tpu.memory_space<vmem>>, %arg3: memref<1x2048xf32, #tpu.memory_space<vmem>>) attributes {dimension_semantics = [#tpu.dimension_semantics<parallel>], iteration_bounds = array<i64: 1>, scalar_prefetch = 0 : i64, scratch_operands = 0 : i64, tpu.core_type = #tpu.core_type<tc>, window_params = [{transform_indices = @transform_0, window_bounds = array<i64: 1>}, {transform_indices = @transform_1, window_bounds = array<i64: 1, 2048>}, {transform_indices = @transform_2, window_bounds = array<i64: 1, 2048>}]} {
    %c0 = arith.constant 0 : index
    %0 = memref.load %arg1[%c0] : memref<1xf32, #tpu.memory_space<smem>>
    %c0_0 = arith.constant 0 : index
    %c0_1 = arith.constant 0 : index
    %1 = vector.load %arg2[%c0_0, %c0_1] : memref<1x2048xf32, #tpu.memory_space<vmem>>, vector<1x2048xf32>
    %2 = vector.broadcast %0 : f32 to vector<1x2048xf32>
    %3 = arith.mulf %1, %2 : vector<1x2048xf32>
    %c0_2 = arith.constant 0 : index
    %c0_3 = arith.constant 0 : index
    %4 = vector.load %arg3[%c0_2, %c0_3] : memref<1x2048xf32, #tpu.memory_space<vmem>>, vector<1x2048xf32>
    tpu.vector_store %arg3[%c0_2, %c0_3], %3 {strides = array<i32>} : memref<1x2048xf32, #tpu.memory_space<vmem>>, vector<1x2048xf32>,
    return
  }
  func.func @transform_0(%arg0: i32) -> i32 {
    %c0_i32 = arith.constant 0 : i32
    %c0_i32_0 = arith.constant 0 : i32
    return %c0_i32 : i32
  }
  func.func @transform_1(%arg0: i32) -> (i32, i32) {
    %c0_i32 = arith.constant 0 : i32
    %c0_i32_0 = arith.constant 0 : i32
    return %arg0, %c0_i32 : i32, i32
  }
  func.func @transform_2(%arg0: i32) -> (i32, i32) {
    %c0_i32 = arith.constant 0 : i32
    %c0_i32_0 = arith.constant 0 : i32
    return %arg0, %c0_i32 : i32, i32
  }
}

</mosaic_0001>

<bundles_post_ra>
// kernel: tpu_custom_call.1
= control target key start
LH: loop header
LB: loop body
LE: loop exit
PB: predicated region body
PF: predicated region fallthrough
CT: control target
= control target key end

     0   :  { %8 = vsyncpa [#allocation4], 0  ;;  %s120_s0 = inlined_call_operand.<no memory space> [shape: f32[1], index: 0, kind: input, shape index: {}]   ;;  %s121_s1 = inlined_call_operand.hbm [shape: f32[1,2048], index: 1, kind: input, shape index: {}]   ;;  %s122_s2 = inlined_call_operand.hbm [shape: f32[1,2048], index: 2, kind: output, shape index: {}]  }
   0x1   :  { %9 = vsyncpa [#allocation5], 0  ;;  %s94_s9 = smov [#allocation3]  }
   0x2   :  { %s18_s10 = sshll.u32 %s94_s9, 4  ;;  %s19_s10 = int_to_ptr.vmem [resolvable:$true] %s18_s10 }
   0x3   :  { %s58_s11 = scalar_lea.vmem %s19_s10, 256  ;;  %p63_p1 = scmp.lt.s32.totalorder %s19_s10, %s19_s10 }
   0x4   :  { %p59_p0 = scmp.ne.s32.totalorder %s19_s10, %s58_s11  ;;  %p64_p2 = scmp.lt.s32.totalorder %s58_s11, %s58_s11 }
   0x6   :  { %p65_p3 = por %p64_p2, %p63_p1 }
   0x8   :  { %p66_p4 = pnand %p65_p3, %p59_p0 }
   0xa   :  { %69 = shalt.err (!%p66_p4)
}
   0xb   :  { %21 = dma.hbm_to_vmem [thread:$0]  %s121_s1, 256, %s19_s10, [#allocation4]  }
   0xc   :  { %90 = dma.done.wait [#allocation4], 256  }
   0xd   :  { %91 = vsyncadd [#allocation4], 4294967040  ;;  %v28_v0 = vstv %s120_s0  ;;  %s95_s16 = smov [#allocation6]   ;;  %v26_v1 = vld [vmem:[#allocation3] sm:$0xff]  ;;  %v27_v2 = vld [vmem:[#allocation3 + $0x8] sm:$0xff] }
   0xe   :  { %s39_s17 = sshll.u32 %s95_s16, 4  ;;  %v29_v3 = vmul.f32 %v28_v0, %v26_v1  ;;  %v30_v4 = vmul.f32 %v28_v0, %v27_v2  ;;  %s40_s17 = int_to_ptr.vmem [resolvable:$true] %s39_s17 }
   0xf   :  { %s70_s18 = scalar_lea.vmem %s40_s17, 256  ;;  %p75_p6 = scmp.lt.s32.totalorder %s40_s17, %s40_s17 }
  0x10   :  { %31 = vst [vmem:[#allocation6] sm:$0xff] %v29_v3  ;;  %32 = vst [vmem:[#allocation6 + $0x8] sm:$0xff] %v30_v4  ;;  %p71_p5 = scmp.ne.s32.totalorder %s40_s17, %s70_s18  ;;  %p76_p7 = scmp.lt.s32.totalorder %s70_s18, %s70_s18 }
  0x12   :  { %p77_p8 = por %p76_p7, %p75_p6 }
  0x14   :  { %p78_p9 = pnand %p77_p8, %p71_p5 }
  0x16   :  { %81 = shalt.err (!%p78_p9)
}
  0x17   :  { %42 = dma.vmem_to_hbm [thread:$0]  %s40_s17, 256, %s122_s2, [#allocation5]  }
  0x18   :  { %92 = dma.done.wait [#allocation5], 256  }
  0x19   :  { %93 = vsyncadd [#allocation5], 4294967040 }
  0x1a   :  { %46 = vsyncpa [#allocation4], 1 }
  0x1b   :  { %47 = vsyncpa [#allocation5], 1 }

</bundles_post_ra>
